<compile_context>
chip_gen: v6e
topology: v6e:2x2x1
jax: 0.10.0
libtpu: 0.0.40
codegen_flags: <defaults>
</compile_context>

<pallas_src>
import math
import functools

import jax
import jax.numpy as jnp
from jax.experimental import pallas as pl
from jax.experimental.pallas import tpu as pltpu


def _laplacian_nll4_kernel(x_ref, p_ref, o_ref, *, params_init, aux_weight):
    x = x_ref[...]
    p = p_ref[...] + params_init
    # |x| * exp(p) - aux_weight * p + log(0.5)   (VPU + EUP elementwise)
    o_ref[...] = jnp.abs(x) * jnp.exp(p) - aux_weight * p + math.log(0.5)


def _choose_layout(total, hw):
    """Pick a lane-dense (rows, cols) factorization of `total`."""
    for cols in (8192, 4096, 2048, 1024, 512, 256, 128):
        if total % cols == 0:
            return total // cols, cols
    # Fallback: natural 2D slab (last dim = full h*w, allowed by Pallas).
    return total // hw, hw


def laplacian_nll4(x, params, *, params_init=0.0, aux_weight=1.0):
    """x: [b, num_recs, h, w]; params: any shape with b*num_recs*h*w elems."""
    b, num_recs, h, w = x.shape
    total = b * num_recs * h * w

    # glue: torch `params.view(bs, num_recs, h, w)` on a contiguous tensor is
    # the same flat ordering, so a flat reshape of both arrays matches.
    rows, cols = _choose_layout(total, h * w)
    x2d = jnp.reshape(x, (rows, cols))
    p2d = jnp.reshape(params, (rows, cols))

    itemsize = jnp.dtype(x2d.dtype).itemsize

    # Block sizing: target ~2 MiB per input block so
    # 3 arrays x 2 buffers x 2 MiB = 12 MiB << scoped VMEM on v5e/v6e/v7x,
    # while being far above the ~600-cycle per-step overhead threshold.
    TARGET_BLOCK_BYTES = 2 * 1024 * 1024
    if rows <= 8:
        rows_per_block = rows                      # full dim (allowed)
    else:
        rpb = (TARGET_BLOCK_BYTES // (cols * itemsize)) // 8 * 8
        rpb = max(8, rpb)
        rows_per_block = min(rpb, rows)
        if rows_per_block != rows:
            # must be a multiple of 8 unless equal to the full dim
            rows_per_block = max(8, (rows_per_block // 8) * 8)

    grid = (pl.cdiv(rows, rows_per_block),)

    kernel = functools.partial(
        _laplacian_nll4_kernel, params_init=params_init, aux_weight=aux_weight
    )

    block = (rows_per_block, cols)
    cost = pl.CostEstimate(
        flops=5 * total,
        transcendentals=total,
        bytes_accessed=3 * total * itemsize,
    )

    out2d = pl.pallas_call(
        kernel,
        out_shape=jax.ShapeDtypeStruct((rows, cols), x2d.dtype),
        grid=grid,
        in_specs=[
            pl.BlockSpec(block, lambda i: (i, 0)),
            pl.BlockSpec(block, lambda i: (i, 0)),
        ],
        out_specs=pl.BlockSpec(block, lambda i: (i, 0)),
        compiler_params=pltpu.CompilerParams(
            dimension_semantics=("parallel",),
            vmem_limit_bytes=32 * 1024 * 1024,
        ),
        cost_estimate=cost,
    )(x2d, p2d)

    return jnp.reshape(out2d, (b, num_recs, h, w))


def laplacian_nll4_ref(x, params, *, params_init=0.0, aux_weight=1.0):
    b, num_recs, h, w = x.shape
    p = jnp.reshape(params, (b, num_recs, h, w)) + params_init
    return jnp.abs(x) * jnp.exp(p) - aux_weight * p + math.log(0.5)


if __name__ == "__main__":
    # Module config (deterministic, in-script): PARAMS_PREDICTED path,
    # num_recs=4, params_init=0.0, aux_weight=1.0.
    b, num_recs, h, w = 2, 4, 16, 16

    key = jax.random.PRNGKey(0)
    kx, kp = jax.random.split(key)
    x = jax.random.normal(kx, (b, num_recs, h, w), dtype=jnp.float32)
    # params come in as [b, num_recs*h*w] and are view-ed inside forward
    params = 0.1 * jax.random.normal(kp, (b, num_recs * h * w), dtype=jnp.float32)

    out = laplacian_nll4(x, params, params_init=0.0, aux_weight=1.0)
    out = jax.block_until_ready(out)

    ref = laplacian_nll4_ref(x, params, params_init=0.0, aux_weight=1.0)
    assert out.shape == (b, num_recs, h, w)
    assert jnp.allclose(out, ref, atol=1e-5, rtol=1e-5), "mismatch vs reference"

    # Sanity-check the tiled path on a production-sized input too
    # (many grid steps, lane-dense 2048-wide slab, partial-edge handling).
    b2, nr2, h2, w2 = 4, 4, 192, 320
    kx2, kp2 = jax.random.split(jax.random.PRNGKey(1))
    x_big = jax.random.normal(kx2, (b2, nr2, h2, w2), dtype=jnp.float32)
    p_big = 0.1 * jax.random.normal(kp2, (b2, nr2 * h2 * w2), dtype=jnp.float32)
    out_big = jax.block_until_ready(
        laplacian_nll4(x_big, p_big, params_init=0.0, aux_weight=1.0)
    )
    ref_big = laplacian_nll4_ref(x_big, p_big, params_init=0.0, aux_weight=1.0)
    assert jnp.allclose(out_big, ref_big, atol=1e-4, rtol=1e-5), "mismatch (big)"

    print("KERNEL_OK")
</pallas_src>

<mosaic_0001>
module attributes {stable_mosaic.version = 11 : i64} {
  func.func @_laplacian_nll4_kernel(%arg0: i32, %arg1: memref<1x2048xf32, #tpu.memory_space<vmem>>, %arg2: memref<1x2048xf32, #tpu.memory_space<vmem>>, %arg3: memref<1x2048xf32, #tpu.memory_space<vmem>>) attributes {dimension_semantics = [#tpu.dimension_semantics<parallel>], iteration_bounds = array<i64: 1>, scalar_prefetch = 0 : i64, scratch_operands = 0 : i64, tpu.core_type = #tpu.core_type<tc>, window_params = [{transform_indices = @transform_0, window_bounds = array<i64: 1, 2048>}, {transform_indices = @transform_1, window_bounds = array<i64: 1, 2048>}, {transform_indices = @transform_2, window_bounds = array<i64: 1, 2048>}]} {
    %c0 = arith.constant 0 : index
    %c0_0 = arith.constant 0 : index
    %0 = vector.load %arg1[%c0, %c0_0] : memref<1x2048xf32, #tpu.memory_space<vmem>>, vector<1x2048xf32>
    %c0_1 = arith.constant 0 : index
    %c0_2 = arith.constant 0 : index
    %1 = vector.load %arg2[%c0_1, %c0_2] : memref<1x2048xf32, #tpu.memory_space<vmem>>, vector<1x2048xf32>
    %cst = arith.constant 0.000000e+00 : f32
    %2 = vector.broadcast %cst : f32 to vector<1x2048xf32>
    %3 = arith.addf %1, %2 : vector<1x2048xf32>
    %4 = math.absf %0 : vector<1x2048xf32>
    %5 = math.exp %3 : vector<1x2048xf32>
    %6 = arith.mulf %4, %5 : vector<1x2048xf32>
    %cst_3 = arith.constant 1.000000e+00 : f32
    %7 = vector.broadcast %cst_3 : f32 to vector<1x2048xf32>
    %8 = arith.mulf %7, %3 : vector<1x2048xf32>
    %9 = arith.subf %6, %8 : vector<1x2048xf32>
    %cst_4 = arith.constant -0.693147182 : f32
    %10 = vector.broadcast %cst_4 : f32 to vector<1x2048xf32>
    %11 = arith.addf %9, %10 : vector<1x2048xf32>
    %c0_5 = arith.constant 0 : index
    %c0_6 = arith.constant 0 : index
    %12 = vector.load %arg3[%c0_5, %c0_6] : memref<1x2048xf32, #tpu.memory_space<vmem>>, vector<1x2048xf32>
    tpu.vector_store %arg3[%c0_5, %c0_6], %11 {strides = array<i32>} : memref<1x2048xf32, #tpu.memory_space<vmem>>, vector<1x2048xf32>,
    return
  }
  func.func @transform_0(%arg0: i32) -> (i32, i32) {
    %c0_i32 = arith.constant 0 : i32
    %c0_i32_0 = arith.constant 0 : i32
    return %arg0, %c0_i32 : i32, i32
  }
  func.func @transform_1(%arg0: i32) -> (i32, i32) {
    %c0_i32 = arith.constant 0 : i32
    %c0_i32_0 = arith.constant 0 : i32
    return %arg0, %c0_i32 : i32, i32
  }
  func.func @transform_2(%arg0: i32) -> (i32, i32) {
    %c0_i32 = arith.constant 0 : i32
    %c0_i32_0 = arith.constant 0 : i32
    return %arg0, %c0_i32 : i32, i32
  }
}

</mosaic_0001>

<bundles_post_ra>
// kernel: tpu_custom_call.1
= control target key start
LH: loop header
LB: loop body
LE: loop exit
PB: predicated region body
PF: predicated region fallthrough
CT: control target
= control target key end

     0   :  { %7 = vsyncpa [#allocation3], 0  ;;  %s172_s0 = inlined_call_operand.hbm [shape: f32[1,2048], index: 0, kind: input, shape index: {}]   ;;  %s173_s1 = inlined_call_operand.hbm [shape: f32[1,2048], index: 1, kind: input, shape index: {}]   ;;  %s174_s2 = inlined_call_operand.hbm [shape: f32[1,2048], index: 2, kind: output, shape index: {}]  }
   0x1   :  { %8 = vsyncpa [#allocation6], 0 }
   0x2   :  { %9 = vsyncpa [#allocation4], 0  ;;  %s145_s9 = smov [#allocation2]   ;;  %s146_s11 = smov [#allocation5]  }
   0x3   :  { %s16_s10 = sshll.u32 %s145_s9, 4  ;;  %s26_s12 = sshll.u32 %s146_s11, 4  ;;  %s17_s10 = int_to_ptr.vmem [resolvable:$true] %s16_s10  ;;  %s27_s12 = int_to_ptr.vmem [resolvable:$true] %s26_s12 }
   0x4   :  { %s87_s13 = scalar_lea.vmem %s17_s10, 256  ;;  %p92_p1 = scmp.lt.s32.totalorder %s17_s10, %s17_s10 }
   0x5   :  { %p88_p0 = scmp.ne.s32.totalorder %s17_s10, %s87_s13  ;;  %p93_p2 = scmp.lt.s32.totalorder %s87_s13, %s87_s13 }
   0x7   :  { %p94_p3 = por %p93_p2, %p92_p1 }
   0x9   :  { %p95_p4 = pnand %p94_p3, %p88_p0 }
   0xb   :  { %98 = shalt.err (!%p95_p4)
}
   0xc   :  { %19 = dma.hbm_to_vmem [thread:$0]  %s172_s0, 256, %s17_s10, [#allocation3]  }
   0xd   :  { %s107_s16 = scalar_lea.vmem %s27_s12, 256  ;;  %p112_p6 = scmp.lt.s32.totalorder %s27_s12, %s27_s12 }
   0xe   :  { %p108_p5 = scmp.ne.s32.totalorder %s27_s12, %s107_s16  ;;  %p113_p7 = scmp.lt.s32.totalorder %s107_s16, %s107_s16 }
  0x10   :  { %p114_p8 = por %p113_p7, %p112_p6 }
  0x12   :  { %p115_p9 = pnand %p114_p8, %p108_p5 }
  0x14   :  { %118 = shalt.err (!%p115_p9)
}
  0x15   :  { %29 = dma.hbm_to_vmem [thread:$0]  %s173_s1, 256, %s27_s12, [#allocation6]  }
  0x16   :  { %139 = dma.done.wait [#allocation3], 256  }
  0x17   :  { %140 = vsyncadd [#allocation3], 4294967040 }
  0x18   :  { %141 = dma.done.wait [#allocation6], 256  }
  0x19   :  { %142 = vsyncadd [#allocation6], 4294967040  ;;  %v38_v0 = vld [vmem:[#allocation5] sm:$0xff]  ;;  %v39_v2 = vld [vmem:[#allocation5 + $0x8] sm:$0xff]  ;;  %s147_s0 = smov [#allocation7]  }
  0x1a   :  { %v44_v1 = vmul.f32 1.442695, %v38_v0  ;;  %v46_v3 = vmul.f32 1.442695, %v39_v2  ;;  %v36_v4 = vld [vmem:[#allocation2] sm:$0xff]  ;;  %v37_v5 = vld [vmem:[#allocation2 + $0x8] sm:$0xff] }
  0x1b   :  { %v42_v6 = vand.u32 2147483647, %v36_v4  ;;  %v43_v7 = vand.u32 2147483647, %v37_v5  ;;  %s62_s1 = sshll.u32 %s147_s0, 4  ;;  %s63_s1 = int_to_ptr.vmem [resolvable:$true] %s62_s1 }
  0x1c   :  { %75 = vpow2.f32 %v44_v1  ;;  %s119_s19 = scalar_lea.vmem %s63_s1, 256  ;;  %p124_p11 = scmp.lt.s32.totalorder %s63_s1, %s63_s1 }
  0x1d   :  { %77 = vpow2.f32 %v46_v3  ;;  %p120_p10 = scmp.ne.s32.totalorder %s63_s1, %s119_s19  ;;  %p125_p12 = scmp.lt.s32.totalorder %s119_s19, %s119_s19 }
  0x1f   :  { %p126_p13 = por %p125_p12, %p124_p11 }
  0x21   :  { %p127_p0 = pnand %p126_p13, %p120_p10 }
  0x29   :  { %v76_v8 = vpop.eup %75 }
  0x2a   :  { %v78_v9 = vpop.eup %77  ;;  %v48_v10 = vmul.f32 %v76_v8, %v42_v6 }
  0x2b   :  { %v49_v11 = vmul.f32 %v78_v9, %v43_v7 }
  0x2c   :  { %v50_v12 = vsub.f32 %v48_v10, %v38_v0 }
  0x2d   :  { %v51_v13 = vsub.f32 %v49_v11, %v39_v2 }
  0x2e   :  { %v52_v14 = vadd.f32 -0.6931472, %v50_v12 }
  0x2f   :  { %v53_v15 = vadd.f32 -0.6931472, %v51_v13 }
  0x30   :  { %54 = vst [vmem:[#allocation7] sm:$0xff] %v52_v14 }
  0x31   :  { %55 = vst [vmem:[#allocation7 + $0x8] sm:$0xff] %v53_v15 }
  0x32   :  { %130 = shalt.err (!%p127_p0)
}
  0x33   :  { %65 = dma.vmem_to_hbm [thread:$0]  %s63_s1, 256, %s174_s2, [#allocation4]  }
  0x34   :  { %143 = dma.done.wait [#allocation4], 256  }
  0x35   :  { %144 = vsyncadd [#allocation4], 4294967040 }
  0x36   :  { %69 = vsyncpa [#allocation3], 1 }
  0x37   :  { %70 = vsyncpa [#allocation6], 1 }
  0x38   :  { %71 = vsyncpa [#allocation4], 1 }

</bundles_post_ra>
